<compile_context>
chip_gen: v6e
topology: v6e:2x2x1
jax: 0.10.0
libtpu: 0.0.40
codegen_flags: <defaults>
</compile_context>

<pallas_src>
import functools
import math

import jax
import jax.numpy as jnp
from jax.experimental import pallas as pl
from jax.experimental.pallas import tpu as pltpu


def _accuracy_kernel(logits_ref, labels_ref, out_ref, *, num_classes, chunk,
                     rows_per_block, rows_valid, need_mask):
    """One block of rows_per_block*128 samples of one batch element.

    logits_ref: (1, C, S, 128)  native dtype (f32 / bf16 / ...)
    labels_ref: (1, S, 128)     int32
    out_ref:    (1, 1, 1, 128)  int32 lane-dense partial match counts
    """
    t = pl.program_id(1)
    trips = rows_per_block // chunk

    if need_mask:
        # Hoisted out of the loop (JAX does not CSE broadcast_in_dim).
        row_iota = jax.lax.broadcasted_iota(jnp.int32, (chunk, 128), 0)
        base = t * rows_per_block

    def body(i, acc):
        r0 = pl.multiple_of(i * chunk, chunk)
        # Strict '>' scan over the (small, static) class axis: first max wins.
        best = logits_ref[0, 0, pl.ds(r0, chunk), :]          # (chunk, 128)
        pred = jnp.zeros((chunk, 128), jnp.int32)
        for cc in range(1, num_classes):                      # static unroll
            xc = logits_ref[0, cc, pl.ds(r0, chunk), :]
            upd = xc > best
            best = jnp.where(upd, xc, best)
            pred = jnp.where(upd, jnp.int32(cc), pred)
        lab = labels_ref[0, pl.ds(r0, chunk), :]              # (chunk, 128)
        match = pred == lab
        if need_mask:
            # Rows past the true row count of this sample are garbage reads
            # from the partial last block -> mask them out.
            match = jnp.logical_and(match, (base + r0 + row_iota) < rows_valid)
        return acc + jnp.sum(match.astype(jnp.int32), axis=0, keepdims=True)

    acc = jax.lax.fori_loop(0, trips, body,
                            jnp.zeros((1, 128), jnp.int32),
                            unroll=min(trips, 4))
    out_ref[...] = acc[None, None]                            # (1,1,1,128)


@functools.partial(jax.jit, static_argnames=("block_bytes",))
def accuracy_pallas(y_pred, y_gt, *, block_bytes=2 * 1024 * 1024):
    """Accuracy of argmax(softmax(y_pred, dim=1)) vs integer labels y_gt.

    y_pred: (N, C, *spatial) logits, any float dtype (read natively)
    y_gt:   (N, *spatial)    integer class labels
    """
    n = y_pred.shape[0]
    c = y_pred.shape[1]
    p = math.prod(y_pred.shape[2:]) if y_pred.ndim > 2 else 1
    m_total = n * p

    dtype_bytes = jnp.dtype(y_pred.dtype).itemsize
    # Sublane tile for the logits dtype: f32 -> 8, bf16/f16 -> 16, int8 -> 32.
    sub = max(8, 32 // dtype_bytes)

    # Free row-major reshapes -- no transpose, no dtype cast.
    logits = y_pred.reshape(n, c, p)
    labels = y_gt.reshape(n, p).astype(jnp.int32)

    # Lane padding only when the per-sample spatial size is not 128-aligned.
    p128 = ((p + 127) // 128) * 128
    if p128 != p:
        # TODO(synk): avoid this full-tensor copy by masking the lane tail
        # in-kernel instead of padding (only hit for non-128-aligned spatial).
        logits = jnp.pad(logits, ((0, 0), (0, 0), (0, p128 - p)))
        labels = jnp.pad(labels, ((0, 0), (0, p128 - p)), constant_values=-1)
    rows = p128 // 128
    logits4 = logits.reshape(n, c, rows, 128)     # free reshape
    labels3 = labels.reshape(n, rows, 128)        # free reshape

    # Byte-budget the per-step logits slab (~2 MiB), scaled by C and dtype.
    if rows < sub:
        s_blk = rows                              # full-dim block: always legal
        chunk = rows
    else:
        budget = block_bytes // (c * 128 * dtype_bytes)
        budget = max(sub, (budget // sub) * sub)
        s_blk = min(budget, (rows // sub) * sub)
        if n == 1 and rows >= 2 * sub:
            # Ensure >= 2 grid steps so v7x megacore gets both TensorCores.
            half = ((-(-rows // 2)) + sub - 1) // sub * sub
            s_blk = max(sub, min(s_blk, half))
        chunk = s_blk
        for ch in (64, 32, 16, 8):                # bound vreg live ranges
            if ch % sub == 0 and s_blk % ch == 0:
                chunk = ch
                break

    tiles = pl.cdiv(rows, s_blk)
    need_mask = tiles * s_blk != rows             # partial last block per sample

    # Only raise the scoped-VMEM limit if the double-buffered blocks need it.
    block_in_bytes = c * s_blk * 128 * dtype_bytes + s_blk * 128 * 4
    vmem_limit = None
    if 2 * block_in_bytes > 12 * 1024 * 1024:
        vmem_limit = min(64 * 1024 * 1024, 4 * block_in_bytes)

    kernel = functools.partial(
        _accuracy_kernel, num_classes=c, chunk=chunk, rows_per_block=s_blk,
        rows_valid=rows, need_mask=need_mask)

    cost = pl.CostEstimate(
        flops=3 * c * n * p128,
        transcendentals=0,
        bytes_accessed=n * c * p128 * dtype_bytes + n * p128 * 4
                       + n * tiles * 128 * 4)

    partials = pl.pallas_call(
        kernel,
        out_shape=jax.ShapeDtypeStruct((n, tiles, 1, 128), jnp.int32),
        grid_spec=pltpu.PrefetchScalarGridSpec(
            num_scalar_prefetch=0,
            grid=(n, tiles),
            in_specs=[
                pl.BlockSpec((1, c, s_blk, 128), lambda i, t: (i, 0, t, 0)),
                pl.BlockSpec((1, s_blk, 128), lambda i, t: (i, t, 0)),
            ],
            out_specs=pl.BlockSpec((1, 1, 1, 128), lambda i, t: (i, t, 0, 0)),
        ),
        compiler_params=pltpu.CompilerParams(
            dimension_semantics=("parallel", "parallel"),
            vmem_limit_bytes=vmem_limit),
        cost_estimate=cost,
    )(logits4, labels3)

    tp = jnp.sum(partials)                        # exact in int32
    # TODO(synk): torch casts the count to DoubleTensor; JAX's default config
    # has float64 disabled, so the score is returned in float32.
    return tp.astype(jnp.float32) / jnp.float32(m_total)


def _accuracy_reference(y_pred, y_gt):
    """Pure-JAX reference matching the PyTorch module."""
    probs = jax.nn.softmax(y_pred.astype(jnp.float32), axis=1)
    pred = jnp.argmax(probs, axis=1)
    tp = jnp.sum((y_gt == pred).astype(jnp.int32))
    return tp.astype(jnp.float32) / y_gt.size


if __name__ == "__main__":
    key = jax.random.PRNGKey(0)
    k1, k2 = jax.random.split(key)

    N, C, H, W = 2, 4, 16, 16
    y_pred = jax.random.normal(k1, (N, C, H, W), dtype=jnp.float32)
    y_gt = jax.random.randint(k2, (N, H, W), 0, C, dtype=jnp.int32)

    score = accuracy_pallas(y_pred, y_gt)
    score = jax.block_until_ready(score)

    ref = _accuracy_reference(y_pred, y_gt)
    assert jnp.allclose(score, ref, atol=1e-6), (score, ref)

    print("KERNEL_OK")
</pallas_src>

<mosaic_0001>
module attributes {stable_mosaic.version = 11 : i64} {
  func.func @_accuracy_kernel(%arg0: i32, %arg1: i32, %arg2: memref<1x4x2x128xf32, #tpu.memory_space<vmem>>, %arg3: memref<1x2x128xi32, #tpu.memory_space<vmem>>, %arg4: memref<1x1x1x128xi32, #tpu.memory_space<vmem>>) attributes {dimension_semantics = [#tpu.dimension_semantics<parallel>, #tpu.dimension_semantics<parallel>], iteration_bounds = array<i64: 2, 1>, scalar_prefetch = 0 : i64, scratch_operands = 0 : i64, tpu.core_type = #tpu.core_type<tc>, window_params = [{transform_indices = @transform_0, window_bounds = array<i64: 1, 4, 2, 128>}, {transform_indices = @transform_1, window_bounds = array<i64: 1, 2, 128>}, {transform_indices = @transform_2, window_bounds = array<i64: 1, 1, 1, 128>}]} {
    %c0_i32 = arith.constant 0 : i32
    %0 = vector.broadcast %c0_i32 : i32 to vector<1x128xi32>
    %c0_i32_0 = arith.constant 0 : i32
    %c2_i32 = arith.constant 2 : i32
    %1 = arith.muli %c0_i32_0, %c2_i32 : i32
    %2 = tpu.assume_multiple %1, 2 : i32
    %c0 = arith.constant 0 : index
    %c0_1 = arith.constant 0 : index
    %3 = arith.index_cast %2 : i32 to index
    %c0_2 = arith.constant 0 : index
    %4 = vector.load %arg2[%c0, %c0_1, %3, %c0_2] : memref<1x4x2x128xf32, #tpu.memory_space<vmem>>, vector<1x1x2x128xf32>
    %5 = vector.shape_cast %4 : vector<1x1x2x128xf32> to vector<2x128xf32>
    %c0_i32_3 = arith.constant 0 : i32
    %6 = vector.broadcast %c0_i32_3 : i32 to vector<2x128xi32>
    %c0_4 = arith.constant 0 : index
    %c1 = arith.constant 1 : index
    %7 = arith.index_cast %2 : i32 to index
    %c0_5 = arith.constant 0 : index
    %8 = vector.load %arg2[%c0_4, %c1, %7, %c0_5] : memref<1x4x2x128xf32, #tpu.memory_space<vmem>>, vector<1x1x2x128xf32>
    %9 = vector.shape_cast %8 : vector<1x1x2x128xf32> to vector<2x128xf32>
    %10 = arith.cmpf ogt, %9, %5 : vector<2x128xf32>
    %11 = arith.select %10, %9, %5 : vector<2x128xi1>, vector<2x128xf32>
    %c1_i32 = arith.constant 1 : i32
    %12 = vector.broadcast %c1_i32 : i32 to vector<2x128xi32>
    %13 = arith.select %10, %12, %6 : vector<2x128xi1>, vector<2x128xi32>
    %c0_6 = arith.constant 0 : index
    %c2 = arith.constant 2 : index
    %14 = arith.index_cast %2 : i32 to index
    %c0_7 = arith.constant 0 : index
    %15 = vector.load %arg2[%c0_6, %c2, %14, %c0_7] : memref<1x4x2x128xf32, #tpu.memory_space<vmem>>, vector<1x1x2x128xf32>
    %16 = vector.shape_cast %15 : vector<1x1x2x128xf32> to vector<2x128xf32>
    %17 = arith.cmpf ogt, %16, %11 : vector<2x128xf32>
    %18 = arith.select %17, %16, %11 : vector<2x128xi1>, vector<2x128xf32>
    %c2_i32_8 = arith.constant 2 : i32
    %19 = vector.broadcast %c2_i32_8 : i32 to vector<2x128xi32>
    %20 = arith.select %17, %19, %13 : vector<2x128xi1>, vector<2x128xi32>
    %c0_9 = arith.constant 0 : index
    %c3 = arith.constant 3 : index
    %21 = arith.index_cast %2 : i32 to index
    %c0_10 = arith.constant 0 : index
    %22 = vector.load %arg2[%c0_9, %c3, %21, %c0_10] : memref<1x4x2x128xf32, #tpu.memory_space<vmem>>, vector<1x1x2x128xf32>
    %23 = vector.shape_cast %22 : vector<1x1x2x128xf32> to vector<2x128xf32>
    %24 = arith.cmpf ogt, %23, %18 : vector<2x128xf32>
    %c3_i32 = arith.constant 3 : i32
    %25 = vector.broadcast %c3_i32 : i32 to vector<2x128xi32>
    %26 = arith.select %24, %25, %20 : vector<2x128xi1>, vector<2x128xi32>
    %c0_11 = arith.constant 0 : index
    %27 = arith.index_cast %2 : i32 to index
    %c0_12 = arith.constant 0 : index
    %28 = vector.load %arg3[%c0_11, %27, %c0_12] : memref<1x2x128xi32, #tpu.memory_space<vmem>>, vector<1x2x128xi32>
    %29 = vector.shape_cast %28 : vector<1x2x128xi32> to vector<2x128xi32>
    %30 = arith.cmpi eq, %26, %29 : vector<2x128xi32>
    %31 = arith.extui %30 : vector<2x128xi1> to vector<2x128xi32>
    %cst = arith.constant dense<0> : vector<128xi32>
    %32 = vector.multi_reduction <add>, %31, %cst [0] : vector<2x128xi32> to vector<128xi32>
    %33 = vector.shape_cast %32 : vector<128xi32> to vector<1x128xi32>
    %34 = arith.addi %0, %33 : vector<1x128xi32>
    %c1_i32_13 = arith.constant 1 : i32
    %35 = vector.shape_cast %34 : vector<1x128xi32> to vector<1x1x1x128xi32>
    %c0_14 = arith.constant 0 : index
    %c0_15 = arith.constant 0 : index
    %c0_16 = arith.constant 0 : index
    %c0_17 = arith.constant 0 : index
    %36 = vector.load %arg4[%c0_14, %c0_15, %c0_16, %c0_17] : memref<1x1x1x128xi32, #tpu.memory_space<vmem>>, vector<1x1x1x128xi32>
    tpu.vector_store %arg4[%c0_14, %c0_15, %c0_16, %c0_17], %35 {strides = array<i32>} : memref<1x1x1x128xi32, #tpu.memory_space<vmem>>, vector<1x1x1x128xi32>,
    return
  }
  func.func @transform_0(%arg0: i32, %arg1: i32) -> (i32, i32, i32, i32) {
    %c0_i32 = arith.constant 0 : i32
    %c0_i32_0 = arith.constant 0 : i32
    %c0_i32_1 = arith.constant 0 : i32
    return %arg0, %c0_i32, %arg1, %c0_i32_0 : i32, i32, i32, i32
  }
  func.func @transform_1(%arg0: i32, %arg1: i32) -> (i32, i32, i32) {
    %c0_i32 = arith.constant 0 : i32
    %c0_i32_0 = arith.constant 0 : i32
    return %arg0, %arg1, %c0_i32 : i32, i32, i32
  }
  func.func @transform_2(%arg0: i32, %arg1: i32) -> (i32, i32, i32, i32) {
    %c0_i32 = arith.constant 0 : i32
    %c0_i32_0 = arith.constant 0 : i32
    %c0_i32_1 = arith.constant 0 : i32
    return %arg0, %arg1, %c0_i32, %c0_i32_0 : i32, i32, i32, i32
  }
}

</mosaic_0001>

<bundles_post_ra>
// kernel: accuracy_pallas.1
= control target key start
LH: loop header
LB: loop body
LE: loop exit
PB: predicated region body
PF: predicated region fallthrough
CT: control target
= control target key end

     0   :  { %s397_s9 = smov 0   ;;  %s399_s10 = smov 0   ;;  %s438_s0 = inlined_call_operand.vmem [shape: f32[2,4,2,128], index: 0, kind: input, shape index: {}]   ;;  %s439_s1 = inlined_call_operand.vmem [shape: s32[2,2,128], index: 1, kind: input, shape index: {}]   ;;  %s440_s2 = inlined_call_operand.vmem [shape: s32[2,1,1,128], index: 2, kind: output, shape index: {}]  }
   0x1   :  { %s401_s11 = smov 0  }
   0x2 LB: > { %s24_s12 = sadd.s32 1, %s375_s10  ;;  %p322_p0 = scmp.ge.s32.totalorder %s379_s11, 1  ;;  %s379_s11 = sphi %s401_s11, %s12_s11   ;;  %s375_s10 = sphi %s399_s10, %s442_s10   ;;  %s371_s9 = sphi %s397_s9, %s441_s9  }
   0x3   : > { %p26_p1 = scmp.ge.s32.totalorder %s24_s12, 2  ;;  %p145_p2 = scmp.lt.s32.totalorder %s379_s11, 3 }
   0x5   : > { %s444_s12 = smov (%p26_p1, %s24_s12), 0  ;;  %p146_p3 = pnand %p322_p0, %p145_p2 }
   0x6   : > { %p178_p4 = scmp.lt.s32.totalorder (!%p146_p3), %s371_s9, 1 }
   0x7   : > { %149 = sbr.rel (%p146_p3) target bundleno = 38 (0x26), region = 28 }
   0xc   : > { %s446_s9 = smov (!%p178_p4, %s371_s9), 1  ;;  %v381_v4 = vmov 0   ;;  %vm220_vm3 = vcmask 1041408  }
   0xd   : > { %s331_s13 = sshll.u32 %s446_s9, 3  ;;  %s325_s14 = sshll.u32 %s446_s9, 1 }
   0xe   : > { %s185_s17 = scalar_lea.vmem %s438_s0, %s331_s13  ;;  %s192_s20 = scalar_lea.vmem %s439_s1, %s325_s14 }
   0xf   : > { %v199_v0 = vld [vmem:[%s185_s17] sm:$0x3]  ;;  %v326_v1 = vld [vmem:[%s185_s17 + $0x2] sm:$0x3]  ;;  %v327_v2 = vld [vmem:[%s185_s17 + $0x4] sm:$0x3]  ;;  %s198_s23 = scalar_lea.vmem %s440_s2, %s446_s9 }
  0x10   : > { %vm203_vm0 = vcmp.gt.f32.partialorder %v326_v1, %v199_v0  ;;  %v328_v6 = vld [vmem:[%s185_s17 + $0x6] sm:$0x3]  ;;  %v217_v9 = vld [vmem:[%s192_s20] sm:$0x3] }
  0x11   : > { %v204_v3 = vsel %vm203_vm0, %v326_v1, %v199_v0  ;;  %v205_v5 = vsel %vm203_vm0, 1, %v381_v4 }
  0x12   : > { %vm209_vm1 = vcmp.gt.f32.partialorder %v327_v2, %v204_v3 }
  0x13   : > { %v210_v7 = vsel %vm209_vm1, %v327_v2, %v204_v3  ;;  %v211_v8 = vsel %vm209_vm1, 2, %v205_v5 }
  0x14   : > { %vm215_vm2 = vcmp.gt.f32.partialorder %v328_v6, %v210_v7 }
  0x15   : > { %v216_v10 = vsel %vm215_vm2, 3, %v211_v8 }
  0x16   : > { %vm218_vm4 = vcmp.eq.s32.totalorder %v216_v10, %v217_v9 }
  0x17   : > { %v219_v11 = vsel %vm218_vm4, 1, %v381_v4 }
  0x18   : > { %v221_v12 = vsel %vm220_vm3, %v219_v11, 0 }
  0x19   : > { %v222_v13 = vrot.slane %v221_v12, 4 }
  0x1b   : > { %v223_v14 = vadd.s32 %v222_v13, %v221_v12 }
  0x1d   : > { %v224_v15 = vrot.slane %v223_v14, 2 }
  0x1f   : > { %v225_v16 = vadd.s32 %v224_v15, %v223_v14 }
  0x21   : > { %v226_v17 = vrot.slane %v225_v16, 1 }
  0x23   : > { %v227_v18 = vadd.s32 %v226_v17, %v225_v16 }
  0x25   : > { %228 = vst [vmem:[%s198_s23] sm:$0x1] %v227_v18 }
  0x26 PF: > { %s12_s11 = sadd.s32 1, %s379_s11   ;;  %s441_s9 = smov %s375_s10 }
  0x27   : > { %p9_p5 = scmp.ge.s32.totalorder %s12_s11, 4   ;;  %s442_s10 = smov %s444_s12 }
  0x29   :  { %11 = sbr.rel (!%p9_p5) target bundleno = 2 (0x2), region = 64 }

</bundles_post_ra>
